<compile_context>
chip_gen: v7x
topology: tpu7x:2x2x1
jax: 0.10.0
libtpu: 0.0.40
codegen_flags: <defaults>
</compile_context>

<pallas_src>
import functools

import jax
import jax.numpy as jnp
from jax.experimental import pallas as pl
from jax.experimental.pallas import tpu as pltpu

_MiB = 1024 * 1024


def _silu_kernel(x_ref, o_ref):
    # Compute in f32; cast back to the input dtype on store.
    x = x_ref[...].astype(jnp.float32)
    # sigmoid(x) == 0.5 * (tanh(x/2) + 1): one EUP transcendental instead of
    # exp + divide; keeps the kernel memory-bound on all generations.
    sig = 0.5 * (jnp.tanh(0.5 * x) + 1.0)
    o_ref[...] = (x * sig).astype(o_ref.dtype)


def _silu_jnp(x):
    """Reference / tail path (same math as the kernel)."""
    xf = x.astype(jnp.float32)
    return (xf * (0.5 * (jnp.tanh(0.5 * xf) + 1.0))).astype(x.dtype)


@functools.lru_cache(maxsize=1)
def _vmem_budget():
    """(target_block_bytes, vmem_limit_bytes) per chip generation."""
    cap = None
    try:
        info = pltpu.get_tpu_info()
        cap = int(getattr(info, "vmem_capacity_bytes"))
    except Exception:
        cap = None
    if cap is not None and cap >= 100 * _MiB:
        # v5e / v6e: 128 MiB physical VMEM -> bigger blocks, raised scoped limit.
        return 8 * _MiB, 64 * _MiB
    # v7x (64 MiB per TC) or unknown: conservative sizing, still > default overlap.
    return 4 * _MiB, 32 * _MiB


def _pick_lane_width(n):
    """Widest lane-dense last dim that divides n (n is a multiple of 128)."""
    for w in (1024, 512, 256, 128):
        if n % w == 0:
            return w
    return 128  # unreachable: n is a multiple of 128


def _run_bulk_kernel(flat, dtype):
    """Run the Pallas kernel on a flat array whose size is a multiple of 128."""
    n = flat.shape[0]
    block_bytes, vmem_limit = _vmem_budget()

    lane = _pick_lane_width(n)
    rows = n // lane
    x2d = flat.reshape(rows, lane)

    itemsize = jnp.dtype(dtype).itemsize
    # Native sublane packing: 8 rows for f32, 16 for bf16, 32 for int8/fp8.
    gran = max(8, 32 // itemsize)
    bytes_per_row = lane * itemsize

    if rows <= gran:
        # Tiny input: single block equal to the full array (always legal).
        tm = rows
        grid_n = 1
    else:
        rows_ceil = pl.cdiv(rows, gran) * gran
        tm = (block_bytes // bytes_per_row) // gran * gran
        tm = max(gran, min(tm, rows_ceil))
        grid_n = pl.cdiv(rows, tm)
        # Target >= 4 grid steps so each v7x TensorCore gets >= 2 steps and the
        # DMA pipeline overlaps; neutral on single-core v5e/v6e.
        min_steps = 4
        if grid_n < min_steps:
            tm_cand = max(gran, pl.cdiv(pl.cdiv(rows_ceil, min_steps), gran) * gran)
            cand_grid = pl.cdiv(rows, tm_cand)
            if cand_grid > grid_n:
                tm, grid_n = tm_cand, cand_grid

    out2d = pl.pallas_call(
        _silu_kernel,
        out_shape=jax.ShapeDtypeStruct((rows, lane), dtype),
        grid_spec=pltpu.PrefetchScalarGridSpec(
            num_scalar_prefetch=0,
            grid=(grid_n,),
            in_specs=[pl.BlockSpec((tm, lane), lambda i: (i, 0))],
            out_specs=pl.BlockSpec((tm, lane), lambda i: (i, 0)),
        ),
        compiler_params=pltpu.CompilerParams(
            dimension_semantics=("parallel",),
            vmem_limit_bytes=vmem_limit,
        ),
    )(x2d)
    return out2d.reshape(-1)


def _silu_impl(x):
    orig_shape = x.shape
    dtype = x.dtype
    n = x.size
    if n == 0:
        return x

    flat = x.reshape(-1)  # metadata-only for contiguous arrays (under jit)
    n_bulk = (n // 128) * 128

    if n_bulk == n:
        out_flat = _run_bulk_kernel(flat, dtype)
    elif n_bulk == 0:
        # Entire input smaller than one vreg row: plain jnp is optimal.
        out_flat = _silu_jnp(flat)
    else:
        # 128-aligned bulk through the kernel, <=127-element tail via jnp.
        bulk = _run_bulk_kernel(flat[:n_bulk], dtype)
        tail = _silu_jnp(flat[n_bulk:])
        out_flat = jnp.concatenate([bulk, tail])

    return out_flat.reshape(orig_shape)


# Public entry point: jit so reshape/concat fuse and launch overhead amortizes.
silu_pallas = jax.jit(_silu_impl)


if __name__ == "__main__":
    key = jax.random.PRNGKey(0)

    # NCHW-style activation input, consistent with the conv-network module.
    x = jax.random.normal(key, (2, 4, 16, 16), dtype=jnp.float32)
    y = silu_pallas(x)
    jax.block_until_ready(y)
    y_ref = x * jax.nn.sigmoid(x)
    assert y.shape == x.shape and y.dtype == x.dtype
    assert jnp.allclose(y, y_ref, atol=1e-5, rtol=1e-5)

    # Larger / ragged shape: exercises the cdiv grid and the unaligned-tail path.
    x2 = jax.random.normal(jax.random.PRNGKey(1), (3, 7, 33, 65), dtype=jnp.float32)
    y2 = silu_pallas(x2)
    jax.block_until_ready(y2)
    assert y2.shape == x2.shape
    assert jnp.allclose(y2, x2 * jax.nn.sigmoid(x2), atol=1e-5, rtol=1e-5)

    # bf16 input: exercises the dtype-aware sublane granularity.
    x3 = jax.random.normal(jax.random.PRNGKey(2), (8, 2048), dtype=jnp.bfloat16)
    y3 = silu_pallas(x3)
    jax.block_until_ready(y3)
    ref3 = (x3.astype(jnp.float32) * jax.nn.sigmoid(x3.astype(jnp.float32)))
    assert y3.shape == x3.shape and y3.dtype == x3.dtype
    assert jnp.allclose(y3.astype(jnp.float32), ref3, atol=2e-2, rtol=2e-2)

    print("KERNEL_OK")
</pallas_src>

<mosaic_0001>
module attributes {stable_mosaic.version = 11 : i64} {
  func.func @_silu_kernel(%arg0: i32, %arg1: memref<2x1024xf32, #tpu.memory_space<vmem>>, %arg2: memref<2x1024xf32, #tpu.memory_space<vmem>>) attributes {dimension_semantics = [#tpu.dimension_semantics<parallel>], iteration_bounds = array<i64: 1>, scalar_prefetch = 0 : i64, scratch_operands = 0 : i64, tpu.core_type = #tpu.core_type<tc>, window_params = [{transform_indices = @transform_0, window_bounds = array<i64: 2, 1024>}, {transform_indices = @transform_1, window_bounds = array<i64: 2, 1024>}]} {
    %c0 = arith.constant 0 : index
    %c0_0 = arith.constant 0 : index
    %0 = vector.load %arg1[%c0, %c0_0] : memref<2x1024xf32, #tpu.memory_space<vmem>>, vector<2x1024xf32>
    %cst = arith.constant 5.000000e-01 : f32
    %1 = vector.broadcast %cst : f32 to vector<2x1024xf32>
    %2 = arith.mulf %1, %0 : vector<2x1024xf32>
    %3 = math.tanh %2 : vector<2x1024xf32>
    %cst_1 = arith.constant 1.000000e+00 : f32
    %4 = vector.broadcast %cst_1 : f32 to vector<2x1024xf32>
    %5 = arith.addf %3, %4 : vector<2x1024xf32>
    %cst_2 = arith.constant 5.000000e-01 : f32
    %6 = vector.broadcast %cst_2 : f32 to vector<2x1024xf32>
    %7 = arith.mulf %6, %5 : vector<2x1024xf32>
    %8 = arith.mulf %0, %7 : vector<2x1024xf32>
    %c0_3 = arith.constant 0 : index
    %c0_4 = arith.constant 0 : index
    %9 = vector.load %arg2[%c0_3, %c0_4] : memref<2x1024xf32, #tpu.memory_space<vmem>>, vector<2x1024xf32>
    tpu.vector_store %arg2[%c0_3, %c0_4], %8 {strides = array<i32>} : memref<2x1024xf32, #tpu.memory_space<vmem>>, vector<2x1024xf32>,
    return
  }
  func.func @transform_0(%arg0: i32) -> (i32, i32) {
    %c0_i32 = arith.constant 0 : i32
    %c0_i32_0 = arith.constant 0 : i32
    return %arg0, %c0_i32 : i32, i32
  }
  func.func @transform_1(%arg0: i32) -> (i32, i32) {
    %c0_i32 = arith.constant 0 : i32
    %c0_i32_0 = arith.constant 0 : i32
    return %arg0, %c0_i32 : i32, i32
  }
}

</mosaic_0001>

<bundles_post_ra>
// kernel: _silu_impl.1
= control target key start
LH: loop header
LB: loop body
LE: loop exit
PB: predicated region body
PF: predicated region fallthrough
CT: control target
= control target key end

     0   :  { %s52_s0 = inlined_call_operand.vmem [shape: f32[2,1024], index: 0, kind: input, shape index: {}]   ;;  %s53_s1 = inlined_call_operand.vmem [shape: f32[2,1024], index: 1, kind: output, shape index: {}]  }
   0x1   :  { %v8_v0 = vld [vmem:[%s52_s0] sm:$0xff]  ;;  %v9_v1 = vld [vmem:[%s52_s0 + $0x8] sm:$0xff] }
   0x2   :  { %v10_v2 = vmul.f32 0.5, %v8_v0  ;;  %v11_v3 = vmul.f32 0.5, %v9_v1 }
   0x4   :  { %26 = vtanh.f32 %v10_v2 }
   0x5   :  { %28 = vtanh.f32 %v11_v3 }
   0xe   :  { %v27_v4 = vpop.eup %26 }
   0xf   :  { %v29_v5 = vpop.eup %28  ;;  %v14_v6 = vadd.f32 1.0, %v27_v4 }
  0x10   :  { %v15_v7 = vadd.f32 1.0, %v29_v5 }
  0x11   :  { %v16_v8 = vmul.f32 0.5, %v14_v6 }
  0x12   :  { %v17_v9 = vmul.f32 0.5, %v15_v7 }
  0x13   :  { %v18_v10 = vmul.f32 %v16_v8, %v8_v0 }
  0x14   :  { %v19_v11 = vmul.f32 %v17_v9, %v9_v1 }
  0x15   :  { %20 = vst [vmem:[%s53_s1] sm:$0xff] %v18_v10 }
  0x16   :  { %21 = vst [vmem:[%s53_s1 + $0x8] sm:$0xff] %v19_v11 }

</bundles_post_ra>
